<compile_context>
chip_gen: v7x
topology: tpu7x:2x2x1
jax: 0.10.0
libtpu: 0.0.40
codegen_flags: <defaults>
</compile_context>

<pallas_src>
import jax
import jax.numpy as jnp
from jax import lax
from jax.experimental import pallas as pl
from jax.experimental.pallas import tpu as pltpu

N_AGE = 13
N_GENDER = 2
N_RACE = 5
C = N_AGE + N_GENDER + N_RACE          # 20
LANE_TILE = 1024                       # batch-lane tile for large B (multiple of 128)


def _make_kernel(b_total: int):
    """Kernel factory; the global batch size is baked in (lane mask + age mean)."""

    def kernel(x_ref, side_ref, out_ref):
        i = pl.program_id(0)
        n = pl.num_programs(0)

        x = x_ref[...].astype(jnp.float32)          # (C, TB) — f32 math even for bf16 input
        s = side_ref[...]                           # (3, TB) float32
        tb = x.shape[1]

        rows = lax.broadcasted_iota(jnp.int32, x.shape, 0)          # (C, TB) channel ids
        col = i * tb + lax.broadcasted_iota(jnp.int32, (1, tb), 1)  # (1, TB) global batch idx
        valid = col < b_total                                       # mask padded lanes

        age_t = s[0:1, :]                           # (1, TB) float targets
        g_lab = s[1:2, :].astype(jnp.int32)         # (1, TB) gender labels
        r_lab = s[2:3, :].astype(jnp.int32)         # (1, TB) race labels

        age_mask = rows < N_AGE
        g_mask = (rows >= N_AGE) & (rows < N_AGE + N_GENDER)
        r_mask = rows >= N_AGE + N_GENDER

        # ---- age head: sum of first 13 channels, smooth-L1 vs target ----
        age_pred = jnp.sum(jnp.where(age_mask, x, 0.0), axis=0, keepdims=True)  # (1, TB)
        d = age_pred - age_t
        ad = jnp.abs(d)
        sl1 = jnp.where(ad < 1.0, 0.5 * d * d, ad - 0.5)            # beta = 1.0
        age_partial = jnp.sum(jnp.where(valid, sl1, 0.0))

        # ---- gender / race heads: fused log-softmax (single exp pass over the tile) ----
        neg = jnp.float32(-1e30)
        g_max = jnp.max(jnp.where(g_mask, x, neg), axis=0, keepdims=True)  # (1, TB)
        r_max = jnp.max(jnp.where(r_mask, x, neg), axis=0, keepdims=True)  # (1, TB)
        shift = jnp.where(r_mask, r_max, g_max)                            # (C, TB)
        e = jnp.exp(x - shift)        # one EUP pass; non-segment rows discarded by selects

        g_sum = jnp.sum(jnp.where(g_mask, e, 0.0), axis=0, keepdims=True)  # (1, TB)
        r_sum = jnp.sum(jnp.where(r_mask, e, 0.0), axis=0, keepdims=True)  # (1, TB)
        g_lse = jnp.log(g_sum) + g_max
        r_lse = jnp.log(r_sum) + r_max

        g_pick = jnp.sum(jnp.where(rows == (g_lab + N_AGE), x, 0.0),
                         axis=0, keepdims=True)
        r_pick = jnp.sum(jnp.where(rows == (r_lab + N_AGE + N_GENDER), x, 0.0),
                         axis=0, keepdims=True)

        g_partial = jnp.sum(jnp.where(valid, g_lse - g_pick, 0.0))
        r_partial = jnp.sum(jnp.where(valid, r_lse - r_pick, 0.0))

        # ---- accumulate into the single SMEM output (resident across the grid) ----
        @pl.when(i == 0)
        def _():
            out_ref[0] = jnp.float32(0.0)
            out_ref[1] = jnp.float32(0.0)
            out_ref[2] = jnp.float32(0.0)

        out_ref[0] = out_ref[0] + age_partial
        out_ref[1] = out_ref[1] + g_partial
        out_ref[2] = out_ref[2] + r_partial

        @pl.when(i == n - 1)
        def _():
            # smooth_l1 reduction='mean' over the GLOBAL batch size
            out_ref[0] = out_ref[0] / jnp.float32(b_total)

    return kernel


def multi_loss(output, age, gender, race):
    """Returns (age_loss, gender_loss, race_loss) as float32 scalars."""
    B, c = output.shape
    assert c == C

    # Lane-dense layout: batch on the 128-lane axis. Keep producer dtype (bf16 OK);
    # all math is done in f32 inside the kernel.
    x = output.T                                                    # (C, B)
    side = jnp.concatenate(
        [age.reshape(1, B).astype(jnp.float32),
         gender.reshape(1, B).astype(jnp.float32),
         race.reshape(1, B).astype(jnp.float32)], axis=0)           # (3, B) single side DMA

    tb = B if B <= LANE_TILE else LANE_TILE
    grid = pl.cdiv(B, tb)

    losses = pl.pallas_call(
        _make_kernel(B),
        out_shape=jax.ShapeDtypeStruct((3,), jnp.float32),
        grid=(grid,),
        in_specs=[
            pl.BlockSpec((C, tb), lambda i: (0, i)),
            pl.BlockSpec((3, tb), lambda i: (0, i)),
        ],
        out_specs=pl.BlockSpec(memory_space=pltpu.MemorySpace.SMEM),
        compiler_params=pltpu.CompilerParams(dimension_semantics=("arbitrary",)),
    )(x, side)
    return losses[0], losses[1], losses[2]


if __name__ == "__main__":
    key = jax.random.PRNGKey(0)
    k1, k2, k3, k4 = jax.random.split(key, 4)

    B = 8
    output = jax.random.normal(k1, (B, C), dtype=jnp.float32)          # (8, 20)
    age = jax.random.uniform(k2, (B, 1), dtype=jnp.float32) * 10.0     # (8, 1) targets
    gender = jax.random.randint(k3, (B,), 0, N_GENDER, dtype=jnp.int32)
    race = jax.random.randint(k4, (B,), 0, N_RACE, dtype=jnp.int32)

    age_loss, gender_loss, race_loss = multi_loss(output, age, gender, race)
    jax.block_until_ready((age_loss, gender_loss, race_loss))

    # Pure-JAX reference (same math as torch.nn.functional).
    age_pred = jnp.sum(output[:, :N_AGE], axis=1, keepdims=True)
    d = age_pred - age
    ref_age = jnp.mean(jnp.where(jnp.abs(d) < 1.0, 0.5 * d * d, jnp.abs(d) - 0.5))

    def ref_ce(logits, labels):
        logp = jax.nn.log_softmax(logits, axis=-1)
        return -jnp.sum(jnp.take_along_axis(logp, labels[:, None], axis=1))

    ref_gender = ref_ce(output[:, N_AGE:N_AGE + N_GENDER], gender)
    ref_race = ref_ce(output[:, N_AGE + N_GENDER:], race)

    assert jnp.allclose(age_loss, ref_age, rtol=1e-5, atol=1e-5)
    assert jnp.allclose(gender_loss, ref_gender, rtol=1e-5, atol=1e-5)
    assert jnp.allclose(race_loss, ref_race, rtol=1e-5, atol=1e-5)

    print("KERNEL_OK")
</pallas_src>

<mosaic_0001>
module attributes {stable_mosaic.version = 11 : i64} {
  func.func @kernel(%arg0: i32, %arg1: memref<20x8xf32, #tpu.memory_space<vmem>>, %arg2: memref<3x8xf32, #tpu.memory_space<vmem>>, %arg3: memref<3xf32, #tpu.memory_space<smem>>) attributes {dimension_semantics = [#tpu.dimension_semantics<arbitrary>], iteration_bounds = array<i64: 1>, scalar_prefetch = 0 : i64, scratch_operands = 0 : i64, tpu.core_type = #tpu.core_type<tc>, window_params = [{transform_indices = @transform_0, window_bounds = array<i64: 20, 8>}, {transform_indices = @transform_1, window_bounds = array<i64: 3, 8>}, {transform_indices = @transform_2, window_bounds = array<i64: 3>}]} {
    %c0 = arith.constant 0 : index
    %c0_0 = arith.constant 0 : index
    %0 = vector.load %arg1[%c0, %c0_0] : memref<20x8xf32, #tpu.memory_space<vmem>>, vector<20x8xf32>
    %c0_1 = arith.constant 0 : index
    %c0_2 = arith.constant 0 : index
    %1 = vector.load %arg2[%c0_1, %c0_2] : memref<3x8xf32, #tpu.memory_space<vmem>>, vector<3x8xf32>
    %2 = tpu.iota {dimensions = array<i32: 0>} : vector<20x8xi32>
    %c8_i32 = arith.constant 8 : i32
    %3 = arith.muli %arg0, %c8_i32 : i32
    %4 = tpu.iota {dimensions = array<i32: 1>} : vector<1x8xi32>
    %5 = vector.broadcast %3 : i32 to vector<1x8xi32>
    %6 = arith.addi %5, %4 : vector<1x8xi32>
    %c8_i32_3 = arith.constant 8 : i32
    %7 = vector.broadcast %c8_i32_3 : i32 to vector<1x8xi32>
    %8 = arith.cmpi slt, %6, %7 : vector<1x8xi32>
    %9 = vector.extract_strided_slice %1 {offsets = [0, 0], sizes = [1, 8], strides = [1, 1]} : vector<3x8xf32> to vector<1x8xf32>
    %10 = vector.extract_strided_slice %1 {offsets = [1, 0], sizes = [1, 8], strides = [1, 1]} : vector<3x8xf32> to vector<1x8xf32>
    %11 = arith.fptosi %10 : vector<1x8xf32> to vector<1x8xi32>
    %12 = vector.extract_strided_slice %1 {offsets = [2, 0], sizes = [1, 8], strides = [1, 1]} : vector<3x8xf32> to vector<1x8xf32>
    %13 = arith.fptosi %12 : vector<1x8xf32> to vector<1x8xi32>
    %c13_i32 = arith.constant 13 : i32
    %14 = vector.broadcast %c13_i32 : i32 to vector<20x8xi32>
    %15 = arith.cmpi slt, %2, %14 : vector<20x8xi32>
    %c13_i32_4 = arith.constant 13 : i32
    %16 = vector.broadcast %c13_i32_4 : i32 to vector<20x8xi32>
    %17 = arith.cmpi sge, %2, %16 : vector<20x8xi32>
    %c15_i32 = arith.constant 15 : i32
    %18 = vector.broadcast %c15_i32 : i32 to vector<20x8xi32>
    %19 = arith.cmpi slt, %2, %18 : vector<20x8xi32>
    %20 = arith.andi %17, %19 : vector<20x8xi1>
    %c15_i32_5 = arith.constant 15 : i32
    %21 = vector.broadcast %c15_i32_5 : i32 to vector<20x8xi32>
    %22 = arith.cmpi sge, %2, %21 : vector<20x8xi32>
    %cst = arith.constant 0.000000e+00 : f32
    %23 = vector.broadcast %cst : f32 to vector<20x8xf32>
    %24 = arith.select %15, %0, %23 : vector<20x8xi1>, vector<20x8xf32>
    %cst_6 = arith.constant dense<0.000000e+00> : vector<8xf32>
    %25 = vector.multi_reduction <add>, %24, %cst_6 [0] : vector<20x8xf32> to vector<8xf32>
    %26 = vector.shape_cast %25 : vector<8xf32> to vector<1x8xf32>
    %27 = arith.subf %26, %9 : vector<1x8xf32>
    %28 = math.absf %27 : vector<1x8xf32>
    %cst_7 = arith.constant 1.000000e+00 : f32
    %29 = vector.broadcast %cst_7 : f32 to vector<1x8xf32>
    %30 = arith.cmpf olt, %28, %29 : vector<1x8xf32>
    %cst_8 = arith.constant 5.000000e-01 : f32
    %31 = vector.broadcast %cst_8 : f32 to vector<1x8xf32>
    %32 = arith.mulf %31, %27 : vector<1x8xf32>
    %33 = arith.mulf %32, %27 : vector<1x8xf32>
    %cst_9 = arith.constant 5.000000e-01 : f32
    %34 = vector.broadcast %cst_9 : f32 to vector<1x8xf32>
    %35 = arith.subf %28, %34 : vector<1x8xf32>
    %36 = arith.select %30, %33, %35 : vector<1x8xi1>, vector<1x8xf32>
    %cst_10 = arith.constant 0.000000e+00 : f32
    %37 = vector.broadcast %cst_10 : f32 to vector<1x8xf32>
    %38 = arith.select %8, %36, %37 : vector<1x8xi1>, vector<1x8xf32>
    %39 = vector.shape_cast %38 : vector<1x8xf32> to vector<1x1x8xf32>
    %cst_11 = arith.constant dense<0.000000e+00> : vector<1xf32>
    %40 = vector.multi_reduction <add>, %39, %cst_11 [1, 2] : vector<1x1x8xf32> to vector<1xf32>
    %41 = vector.shape_cast %40 : vector<1xf32> to vector<1x1x1xf32>
    %42 = vector.extract %41[0, 0, 0] : f32 from vector<1x1x1xf32>
    %cst_12 = arith.constant -1.000000e+30 : f32
    %43 = vector.broadcast %cst_12 : f32 to vector<20x8xf32>
    %44 = arith.select %20, %0, %43 : vector<20x8xi1>, vector<20x8xf32>
    %cst_13 = arith.constant dense<0xFF800000> : vector<8xf32>
    %45 = vector.multi_reduction <maximumf>, %44, %cst_13 [0] : vector<20x8xf32> to vector<8xf32>
    %46 = vector.shape_cast %45 : vector<8xf32> to vector<1x8xf32>
    %cst_14 = arith.constant -1.000000e+30 : f32
    %47 = vector.broadcast %cst_14 : f32 to vector<20x8xf32>
    %48 = arith.select %22, %0, %47 : vector<20x8xi1>, vector<20x8xf32>
    %cst_15 = arith.constant dense<0xFF800000> : vector<8xf32>
    %49 = vector.multi_reduction <maximumf>, %48, %cst_15 [0] : vector<20x8xf32> to vector<8xf32>
    %50 = vector.shape_cast %49 : vector<8xf32> to vector<1x8xf32>
    %51 = vector.shape_cast %50 : vector<1x8xf32> to vector<1x8xf32>
    %52 = vector.broadcast %51 : vector<1x8xf32> to vector<20x8xf32>
    %53 = vector.shape_cast %46 : vector<1x8xf32> to vector<1x8xf32>
    %54 = vector.broadcast %53 : vector<1x8xf32> to vector<20x8xf32>
    %55 = arith.select %22, %52, %54 : vector<20x8xi1>, vector<20x8xf32>
    %56 = arith.subf %0, %55 : vector<20x8xf32>
    %57 = math.exp %56 : vector<20x8xf32>
    %cst_16 = arith.constant 0.000000e+00 : f32
    %58 = vector.broadcast %cst_16 : f32 to vector<20x8xf32>
    %59 = arith.select %20, %57, %58 : vector<20x8xi1>, vector<20x8xf32>
    %cst_17 = arith.constant dense<0.000000e+00> : vector<8xf32>
    %60 = vector.multi_reduction <add>, %59, %cst_17 [0] : vector<20x8xf32> to vector<8xf32>
    %61 = vector.shape_cast %60 : vector<8xf32> to vector<1x8xf32>
    %cst_18 = arith.constant 0.000000e+00 : f32
    %62 = vector.broadcast %cst_18 : f32 to vector<20x8xf32>
    %63 = arith.select %22, %57, %62 : vector<20x8xi1>, vector<20x8xf32>
    %cst_19 = arith.constant dense<0.000000e+00> : vector<8xf32>
    %64 = vector.multi_reduction <add>, %63, %cst_19 [0] : vector<20x8xf32> to vector<8xf32>
    %65 = vector.shape_cast %64 : vector<8xf32> to vector<1x8xf32>
    %66 = math.log %61 : vector<1x8xf32>
    %67 = arith.addf %66, %46 : vector<1x8xf32>
    %68 = math.log %65 : vector<1x8xf32>
    %69 = arith.addf %68, %50 : vector<1x8xf32>
    %c13_i32_20 = arith.constant 13 : i32
    %70 = vector.broadcast %c13_i32_20 : i32 to vector<1x8xi32>
    %71 = arith.addi %11, %70 : vector<1x8xi32>
    %72 = vector.broadcast %71 : vector<1x8xi32> to vector<20x8xi32>
    %73 = arith.cmpi eq, %2, %72 : vector<20x8xi32>
    %cst_21 = arith.constant 0.000000e+00 : f32
    %74 = vector.broadcast %cst_21 : f32 to vector<20x8xf32>
    %75 = arith.select %73, %0, %74 : vector<20x8xi1>, vector<20x8xf32>
    %cst_22 = arith.constant dense<0.000000e+00> : vector<8xf32>
    %76 = vector.multi_reduction <add>, %75, %cst_22 [0] : vector<20x8xf32> to vector<8xf32>
    %77 = vector.shape_cast %76 : vector<8xf32> to vector<1x8xf32>
    %c13_i32_23 = arith.constant 13 : i32
    %78 = vector.broadcast %c13_i32_23 : i32 to vector<1x8xi32>
    %79 = arith.addi %13, %78 : vector<1x8xi32>
    %c2_i32 = arith.constant 2 : i32
    %80 = vector.broadcast %c2_i32 : i32 to vector<1x8xi32>
    %81 = arith.addi %79, %80 : vector<1x8xi32>
    %82 = vector.broadcast %81 : vector<1x8xi32> to vector<20x8xi32>
    %83 = arith.cmpi eq, %2, %82 : vector<20x8xi32>
    %cst_24 = arith.constant 0.000000e+00 : f32
    %84 = vector.broadcast %cst_24 : f32 to vector<20x8xf32>
    %85 = arith.select %83, %0, %84 : vector<20x8xi1>, vector<20x8xf32>
    %cst_25 = arith.constant dense<0.000000e+00> : vector<8xf32>
    %86 = vector.multi_reduction <add>, %85, %cst_25 [0] : vector<20x8xf32> to vector<8xf32>
    %87 = vector.shape_cast %86 : vector<8xf32> to vector<1x8xf32>
    %88 = arith.subf %67, %77 : vector<1x8xf32>
    %cst_26 = arith.constant 0.000000e+00 : f32
    %89 = vector.broadcast %cst_26 : f32 to vector<1x8xf32>
    %90 = arith.select %8, %88, %89 : vector<1x8xi1>, vector<1x8xf32>
    %91 = vector.shape_cast %90 : vector<1x8xf32> to vector<1x1x8xf32>
    %cst_27 = arith.constant dense<0.000000e+00> : vector<1xf32>
    %92 = vector.multi_reduction <add>, %91, %cst_27 [1, 2] : vector<1x1x8xf32> to vector<1xf32>
    %93 = vector.shape_cast %92 : vector<1xf32> to vector<1x1x1xf32>
    %94 = vector.extract %93[0, 0, 0] : f32 from vector<1x1x1xf32>
    %95 = arith.subf %69, %87 : vector<1x8xf32>
    %cst_28 = arith.constant 0.000000e+00 : f32
    %96 = vector.broadcast %cst_28 : f32 to vector<1x8xf32>
    %97 = arith.select %8, %95, %96 : vector<1x8xi1>, vector<1x8xf32>
    %98 = vector.shape_cast %97 : vector<1x8xf32> to vector<1x1x8xf32>
    %cst_29 = arith.constant dense<0.000000e+00> : vector<1xf32>
    %99 = vector.multi_reduction <add>, %98, %cst_29 [1, 2] : vector<1x1x8xf32> to vector<1xf32>
    %100 = vector.shape_cast %99 : vector<1xf32> to vector<1x1x1xf32>
    %101 = vector.extract %100[0, 0, 0] : f32 from vector<1x1x1xf32>
    %c0_i32 = arith.constant 0 : i32
    %102 = arith.cmpi eq, %arg0, %c0_i32 : i32
    %103 = arith.extui %102 : i1 to i32
    %c0_i32_30 = arith.constant 0 : i32
    %104 = arith.cmpi ne, %103, %c0_i32_30 : i32
    scf.if %104 {
      %cst_37 = arith.constant 0.000000e+00 : f32
      %c0_38 = arith.constant 0 : index
      %117 = memref.load %arg3[%c0_38] : memref<3xf32, #tpu.memory_space<smem>>
      memref.store %cst_37, %arg3[%c0_38] : memref<3xf32, #tpu.memory_space<smem>>
      %cst_39 = arith.constant 0.000000e+00 : f32
      %c1_40 = arith.constant 1 : index
      %118 = memref.load %arg3[%c1_40] : memref<3xf32, #tpu.memory_space<smem>>
      memref.store %cst_39, %arg3[%c1_40] : memref<3xf32, #tpu.memory_space<smem>>
      %cst_41 = arith.constant 0.000000e+00 : f32
      %c2_42 = arith.constant 2 : index
      %119 = memref.load %arg3[%c2_42] : memref<3xf32, #tpu.memory_space<smem>>
      memref.store %cst_41, %arg3[%c2_42] : memref<3xf32, #tpu.memory_space<smem>>
    } else {
    }
    %c0_31 = arith.constant 0 : index
    %105 = memref.load %arg3[%c0_31] : memref<3xf32, #tpu.memory_space<smem>>
    %106 = arith.addf %105, %42 : f32
    %c0_32 = arith.constant 0 : index
    %107 = memref.load %arg3[%c0_32] : memref<3xf32, #tpu.memory_space<smem>>
    memref.store %106, %arg3[%c0_32] : memref<3xf32, #tpu.memory_space<smem>>
    %c1 = arith.constant 1 : index
    %108 = memref.load %arg3[%c1] : memref<3xf32, #tpu.memory_space<smem>>
    %109 = arith.addf %108, %94 : f32
    %c1_33 = arith.constant 1 : index
    %110 = memref.load %arg3[%c1_33] : memref<3xf32, #tpu.memory_space<smem>>
    memref.store %109, %arg3[%c1_33] : memref<3xf32, #tpu.memory_space<smem>>
    %c2 = arith.constant 2 : index
    %111 = memref.load %arg3[%c2] : memref<3xf32, #tpu.memory_space<smem>>
    %112 = arith.addf %111, %101 : f32
    %c2_34 = arith.constant 2 : index
    %113 = memref.load %arg3[%c2_34] : memref<3xf32, #tpu.memory_space<smem>>
    memref.store %112, %arg3[%c2_34] : memref<3xf32, #tpu.memory_space<smem>>
    %c0_i32_35 = arith.constant 0 : i32
    %114 = arith.cmpi eq, %arg0, %c0_i32_35 : i32
    %115 = arith.extui %114 : i1 to i32
    %c0_i32_36 = arith.constant 0 : i32
    %116 = arith.cmpi ne, %115, %c0_i32_36 : i32
    scf.if %116 {
      %c0_37 = arith.constant 0 : index
      %117 = memref.load %arg3[%c0_37] : memref<3xf32, #tpu.memory_space<smem>>
      %cst_38 = arith.constant 8.000000e+00 : f32
      %118 = arith.divf %117, %cst_38 : f32
      %c0_39 = arith.constant 0 : index
      %119 = memref.load %arg3[%c0_39] : memref<3xf32, #tpu.memory_space<smem>>
      memref.store %118, %arg3[%c0_39] : memref<3xf32, #tpu.memory_space<smem>>
    } else {
    }
    return
  }
  func.func @transform_0(%arg0: i32) -> (i32, i32) {
    %c0_i32 = arith.constant 0 : i32
    %c0_i32_0 = arith.constant 0 : i32
    return %c0_i32, %arg0 : i32, i32
  }
  func.func @transform_1(%arg0: i32) -> (i32, i32) {
    %c0_i32 = arith.constant 0 : i32
    %c0_i32_0 = arith.constant 0 : i32
    return %c0_i32, %arg0 : i32, i32
  }
  func.func @transform_2(%arg0: i32) -> i32 {
    %c0_i32 = arith.constant 0 : i32
    %c0_i32_0 = arith.constant 0 : i32
    return %c0_i32 : i32
  }
}

</mosaic_0001>

<bundles_post_ra>
// kernel: tpu_custom_call.1
= control target key start
LH: loop header
LB: loop body
LE: loop exit
PB: predicated region body
PF: predicated region fallthrough
CT: control target
= control target key end

     0   :  { %v16_v0 = vlaneseq  ;;  %vm45_vm0 = vcmask 64512   ;;  %s423_s0 = inlined_call_operand.vmem [shape: f32[20,8], index: 0, kind: input, shape index: {}]   ;;  %s424_s1 = inlined_call_operand.vmem [shape: f32[3,8], index: 1, kind: input, shape index: {}]   ;;  %s425_s2 = inlined_call_operand.hbm [shape: f32[3], index: 2, kind: output, shape index: {}]  }
   0x1   :  { %v316_v1 = vld [vmem:[%s423_s0] sm:$0xff] }
   0x2   :  { %v318_v2 = vshrl.u32 %v16_v0, 7 }
   0x3   :  { %7 = vsyncpa [#allocation3], 0  ;;  %v323_v3 = vld [vmem:[%s423_s0 + $0x8] sm:$0xff]  ;;  %v46_v5 = vsel %vm45_vm0, %v316_v1, 0.0  ;;  %v333_v6 = vld [vmem:[%s423_s0 + $0x10] sm:$0xf] }
   0x4   :  { %v326_v4 = vadd.s32 8, %v318_v2  ;;  %vm49_vm1 = vcmask 60416   ;;  %v296_v7 = vmov -inf   ;;  %v15_v16 = vld [vmem:[%s424_s1] sm:$0x7]  ;;  %v360_v42 = vand.u32 127, %v16_v0 }
   0x5   :  { %v80_v8 = vsel %vm45_vm0, -1e+30, %v296_v7  ;;  %v96_v15 = vsel %vm49_vm1, %v333_v6, -inf  ;;  %v82_v19 = vsel %vm49_vm1, -1e+30, %v296_v7  ;;  %v265_v24 = vtrunc.f32 %v15_v16  ;;  %s284_s21 = scalar_lea.hbm %s425_s2, 16 }
   0x6   :  { %vm28_vm2 = vcmp.lt.s32.totalorder %v326_v4, 13  ;;  %vm31_vm3 = vcmp.ge.s32.totalorder %v326_v4, 13  ;;  %vm34_vm4 = vcmp.lt.s32.totalorder %v326_v4, 15  ;;  %vm40_vm5 = vcmp.ge.s32.totalorder %v326_v4, 15  ;;  %p285_p0 = scmp.ne.s32.totalorder %s425_s2, %s284_s21  ;;  %p288_p1 = scmp.lt.u32.totalorder %s284_s21, %s425_s2 }
   0x7   :  { %v43_v9 = vsel %vm28_vm2, %v323_v3, 0.0  ;;  %vm341_vm6 = vmand %vm31_vm3, %vm34_vm4  ;;  %v92_v11 = vsel %vm40_vm5, %v323_v3, -1e+30  ;;  %v266_v31 = vcvt.f32.s32 %v265_v24  ;;  %v154_v43 = vsub.s32 1, %v318_v2 }
   0x8   :  { %v47_v12 = vsel %vm45_vm0, %v43_v9, 0.0  ;;  %v78_v13 = vsel %vm341_vm6, %v323_v3, -1e+30  ;;  %v95_v14 = vsel %vm45_vm0, %v92_v11, -inf  ;;  %v176_v48 = vsub.s32 2, %v318_v2  ;;  %p290_p2 = pnand %p288_p1, %p285_p0 }
   0x9   :  { %v48_v17 = vadd.f32 %v47_v12, %v46_v5  ;;  %v81_v18 = vsel %vm45_vm0, %v78_v13, -inf  ;;  %v97_v20 = vmax.f32 %v80_v8, %v95_v14  ;;  %v151_v38 = vadd.s32 13, %v266_v31 }
   0xa   :  { %v83_v21 = vmax.f32 %v80_v8, %v81_v18  ;;  %vm25_vm7 = vcmp.lt.s32.totalorder %v360_v42, 8  ;;  %vm66_vm9 = vcmask 57344   ;;  %v19_v61 = vadd.s32 16, %v318_v2 }
   0xb   :  { %v52_v22 = vrot.slane %v48_v17, 4  ;;  %v98_v23 = vmax.f32 %v97_v20, %v96_v15  ;;  %v173_v47 = vadd.s32 2, %v151_v38  ;;  %v155_v53 = vrot.slane %v151_v38, %v154_v43 }
   0xc   :  { %v84_v25 = vmax.f32 %v83_v21, %v82_v19 }
   0xd   :  { %v53_v26 = vadd.f32 %v52_v22, %v48_v17  ;;  %v99_v27 = vrot.slane %v98_v23, 4  ;;  %v177_v58 = vrot.slane %v173_v47, %v176_v48  ;;  %vm156_vm10 = vcmp.eq.s32.totalorder %v318_v2, %v155_v53 }
   0xe   :  { %v85_v28 = vrot.slane %v84_v25, 4  ;;  %vm157_vm11 = vcmp.eq.s32.totalorder %v326_v4, %v155_v53  ;;  %v159_v5 = vsel %vm156_vm10, %v316_v1, 0.0  ;;  %vm158_vm14 = vcmp.eq.s32.totalorder %v19_v61, %v155_v53 }
   0xf   :  { %v54_v29 = vrot.slane %v53_v26, 2  ;;  %v100_v30 = vmax.f32 %v98_v23, %v99_v27  ;;  %vm178_vm12 = vcmp.eq.s32.totalorder %v318_v2, %v177_v58  ;;  %vm179_vm13 = vcmp.eq.s32.totalorder %v326_v4, %v177_v58 }
  0x10   :  { %v86_v32 = vmax.f32 %v84_v25, %v85_v28  ;;  %v160_v7 = vsel %vm157_vm11, %v323_v3, 0.0  ;;  %v181_v8 = vsel %vm178_vm12, %v316_v1, 0.0  ;;  %v182_v9 = vsel %vm179_vm13, %v323_v3, 0.0 }
  0x11   :  { %v55_v33 = vadd.f32 %v54_v29, %v53_v26  ;;  %v101_v34 = vrot.slane %v100_v30, 2  ;;  %v162_v11 = vsel %vm45_vm0, %v159_v5, 0.0  ;;  %v163_v12 = vsel %vm45_vm0, %v160_v7, 0.0 }
  0x12   :  { %v87_v35 = vrot.slane %v86_v32, 2  ;;  %vm180_vm15 = vcmp.eq.s32.totalorder %v19_v61, %v177_v58  ;;  %v161_v13 = vsel %vm158_vm14, %v333_v6, 0.0  ;;  %v184_v2 = vsel %vm45_vm0, %v181_v8, 0.0 }
  0x13   :  { %v56_v36 = vrot.slane %v55_v33, 1  ;;  %v102_v37 = vmax.f32 %v100_v30, %v101_v34  ;;  %v185_v14 = vsel %vm45_vm0, %v182_v9, 0.0  ;;  %v164_v15 = vadd.f32 %v163_v12, %v162_v11 }
  0x14   :  { %v88_v39 = vmax.f32 %v86_v32, %v87_v35  ;;  %v165_v18 = vsel %vm49_vm1, %v161_v13, 0.0  ;;  %v186_v19 = vadd.f32 %v185_v14, %v184_v2 }
  0x15   :  { %v57_v40 = vadd.f32 %v56_v36, %v55_v33  ;;  %v103_v41 = vrot.slane %v102_v37, 1  ;;  %v166_v24 = vadd.f32 %v165_v18, %v164_v15 }
  0x16   :  { %v89_v44 = vrot.slane %v88_v39, 1 }
  0x17   :  { %v58_v45 = vsub.f32 %v57_v40, %v15_v16  ;;  %v363_v46 = vmax.f32 %v102_v37, %v103_v41  ;;  %v183_v16 = vsel %vm180_vm15, %v333_v6, 0.0  ;;  %v167_v30 = vrot.slane %v166_v24, 4 }
  0x18   :  { %v366_v49 = vmax.f32 %v88_v39, %v89_v44  ;;  %v187_v22 = vsel %vm49_vm1, %v183_v16, 0.0 }
  0x19   :  { %v59_v50 = vand.u32 2147483647, %v58_v45  ;;  %v61_v51 = vmul.f32 0.5, %v58_v45  ;;  %v110_v52 = vsub.f32 %v333_v6, %v363_v46  ;;  %v188_v27 = vadd.f32 %v187_v22, %v186_v19 }
  0x1a   :  { %v106_v54 = vsel %vm40_vm5, %v363_v46, %v366_v49  ;;  %v168_v4 = vadd.f32 %v167_v30, %v166_v24 }
  0x1b   :  { %vm60_vm8 = vcmp.lt.f32.partialorder %v59_v50, 1.0  ;;  %v62_v55 = vmul.f32 %v61_v51, %v58_v45  ;;  %v262_v56 = vadd.f32 -0.5, %v59_v50  ;;  %v109_v57 = vsub.f32 %v323_v3, %v106_v54 }
  0x1c   :  { %v115_v59 = vmul.f32 1.442695, %v110_v52  ;;  %v189_v10 = vrot.slane %v188_v27, 4  ;;  %v169_v40 = vrot.slane %v168_v4, 2 }
  0x1d   :  { %v64_v60 = vsel %vm60_vm8, %v62_v55, %v262_v56  ;;  %v113_v62 = vmul.f32 1.442695, %v109_v57 }
  0x1e   :  { %v65_v63 = vsel %vm25_vm7, %v64_v60, 0.0  ;;  %276 = vpow2.f32 %v115_v59  ;;  %v190_v37 = vadd.f32 %v189_v10, %v188_v27  ;;  %v170_v44 = vadd.f32 %v169_v40, %v168_v4 }
  0x1f   :  { %v67_v0 = vsel %vm66_vm9, %v65_v63, 0.0  ;;  %278 = vpow2.f32 %v113_v62 }
  0x20   :  { %68 = vadd.xlane.f32.xlu0 %v67_v0  ;;  %v191_v43 = vrot.slane %v190_v37, 2  ;;  %v171_v47 = vrot.slane %v170_v44, 1 }
  0x22   :  { %v192_v45 = vadd.f32 %v191_v43, %v190_v37  ;;  %v172_v52 = vadd.f32 %v171_v47, %v170_v44 }
  0x24   :  { %v193_v48 = vrot.slane %v192_v45, 1 }
  0x26   :  { %v194_v56 = vadd.f32 %v193_v48, %v192_v45 }
  0x28   :  { %v277_v17 = vpop.eup %276 }
  0x29   :  { %v279_v1 = vpop.eup %278  ;;  %v137_v3 = vsel %vm49_vm1, %v277_v17, 0.0 }
  0x2a   :  { %v118_v20 = vsel %vm341_vm6, %v279_v1, 0.0  ;;  %v132_v21 = vsel %vm40_vm5, %v279_v1, 0.0 }
  0x2b   :  { %v121_v23 = vsel %vm45_vm0, %v118_v20, 0.0  ;;  %v135_v6 = vsel %vm45_vm0, %v132_v21, 0.0 }
  0x2c   :  { %v125_v25 = vrot.slane %v121_v23, 4  ;;  %v138_v26 = vadd.f32 %v137_v3, %v135_v6 }
  0x2e   :  { %v126_v28 = vadd.f32 %v125_v25, %v121_v23  ;;  %v139_v29 = vrot.slane %v138_v26, 4 }
  0x30   :  { %v127_v31 = vrot.slane %v126_v28, 2  ;;  %v140_v32 = vadd.f32 %v139_v29, %v138_v26 }
  0x32   :  { %v128_v33 = vadd.f32 %v127_v31, %v126_v28  ;;  %v141_v34 = vrot.slane %v140_v32, 2 }
  0x34   :  { %v129_v35 = vrot.slane %v128_v33, 1  ;;  %v142_v36 = vadd.f32 %v141_v34, %v140_v32 }
  0x36   :  { %v130_v38 = vadd.f32 %v129_v35, %v128_v33  ;;  %v143_v39 = vrot.slane %v142_v36, 1 }
  0x38   :  { %280 = vlog2.f32 %v130_v38  ;;  %v144_v41 = vadd.f32 %v143_v39, %v142_v36 }
  0x3a   :  { %282 = vlog2.f32 %v144_v41 }
  0x42   :  { %v281_v50 = vpop.eup %280 }
  0x43   :  { %v146_v51 = vmul.f32 0.6931472, %v281_v50 }
  0x44   :  { %v283_v53 = vpop.eup %282 }
  0x45   :  { %v147_v54 = vadd.f32 %v146_v51, %v366_v49  ;;  %v149_v55 = vmul.f32 0.6931472, %v283_v53 }
  0x47   :  { %v195_v57 = vsub.f32 %v147_v54, %v172_v52  ;;  %v150_v58 = vadd.f32 %v149_v55, %v363_v46 }
  0x49   :  { %v196_v59 = vsel %vm25_vm7, %v195_v57, 0.0  ;;  %v207_v60 = vsub.f32 %v150_v58, %v194_v56 }
  0x4a   :  { %v197_v61 = vsel %vm66_vm9, %v196_v59, 0.0 }
  0x4b   :  { %198 = vadd.xlane.f32.xlu0 %v197_v61  ;;  %v208_v62 = vsel %vm25_vm7, %v207_v60, 0.0 }
  0x4c   :  { %v209_v63 = vsel %vm66_vm9, %v208_v62, 0.0 }
  0x4d   :  { %210 = vadd.xlane.f32.xlu1 %v209_v63 }
  0xad   :  { %v69_v0 = vpop.xlane.xlu0 %68 }
  0xae   :  { %v70_v49 = vrot.slane %v69_v0, 4 }
  0xb0   :  { %v71_v5 = vadd.f32 %v70_v49, %v69_v0 }
  0xb2   :  { %v72_v7 = vrot.slane %v71_v5, 2 }
  0xb4   :  { %v73_v8 = vadd.f32 %v72_v7, %v71_v5 }
  0xb6   :  { %v74_v9 = vrot.slane %v73_v8, 1 }
  0xb8   :  { %v75_v46 = vadd.f32 %v74_v9, %v73_v8 }
  0xba   :  { %267 = vpush %v75_v46 }
  0xd8   :  { %v199_v11 = vpop.xlane.xlu0 %198 }
  0xd9   :  { %v200_v12 = vrot.slane %v199_v11, 4 }
  0xda   :  { %v211_v13 = vpop.xlane.xlu1 %210 }
  0xdb   :  { %v201_v2 = vadd.f32 %v200_v12, %v199_v11  ;;  %v212_v14 = vrot.slane %v211_v13, 4 }
  0xdd   :  { %v202_v15 = vrot.slane %v201_v2, 2  ;;  %v213_v16 = vadd.f32 %v212_v14, %v211_v13 }
  0xdf   :  { %v203_v42 = vadd.f32 %v202_v15, %v201_v2  ;;  %v214_v17 = vrot.slane %v213_v16, 2 }
  0xe1   :  { %v215_v18 = vadd.f32 %v214_v17, %v213_v16  ;;  %v204_v1 = vrot.slane %v203_v42, 1 }
  0xe3   :  { %v205_v3 = vadd.f32 %v204_v1, %v203_v42  ;;  %v216_v19 = vrot.slane %v215_v18, 1 }
  0xe5   :  { %269 = vpush %v205_v3  ;;  %v217_v20 = vadd.f32 %v216_v19, %v215_v18 }
  0xe7   :  { %271 = vpush %v217_v20 }
  0xeb   :  { %s268_s1 = spop %267 }
  0xec   :  { %s247_s16 = smul.f32 0.125, %s268_s1 }
  0xee   :  { %248 = sst [smem:[#allocation2]] %s247_s16 }
 0x116   :  { %s270_s17 = spop %269 }
 0x117   :  { %236 = sst [smem:[#allocation2 + $0x1]] %s270_s17 }
 0x118   :  { %s272_s18 = spop %271 }
 0x119   :  { %240 = sst [smem:[#allocation2 + $0x2]] %s272_s18 }
 0x11a   :  { %293 = shalt.err (!%p290_p2)
}
 0x11b   :  { %s297_s26 = smov [#allocation2]  }
 0x11c   :  { %256 = dma.smem_to_hbm %s297_s26, 16, %s425_s2, [#allocation3]  }
 0x11d   :  { %294 = dma.done.wait [#allocation3], 16  }
 0x11e   :  { %295 = vsyncadd [#allocation3], 4294967280 }
 0x11f   :  { %260 = sfence }
 0x120   :  { %261 = vsyncpa [#allocation3], 1 }

</bundles_post_ra>
